<compile_context>
chip_gen: v5e
topology: v5e:2x2
jax: 0.10.0
libtpu: 0.0.40
codegen_flags: <defaults>
</compile_context>

<pallas_src>
import functools

import jax
import jax.numpy as jnp
from jax import lax
from jax.experimental import pallas as pl
from jax.experimental.pallas import tpu as pltpu


def _detr_attention_kernel(num_heads, head_dim, compute_dtype, separate_kv, *refs):
    if separate_kv:
        (x_q_ref, pos_q_ref, x_kv_ref, pos_kv_ref,
         wq_ref, bq_ref, wk_ref, bk_ref, wv_ref, bv_ref,
         wo_ref, bo_ref, out_ref) = refs
    else:
        (x_q_ref, pos_q_ref,
         wq_ref, bq_ref, wk_ref, bk_ref, wv_ref, bv_ref,
         wo_ref, bo_ref, out_ref) = refs
        x_kv_ref, pos_kv_ref = x_q_ref, pos_q_ref

    cdt = compute_dtype

    # with_pos_embed — computed once per (batch, q-tile), not per head.
    hs_q = x_q_ref[0]                                   # (Tq, E)
    hs_pe_q = (hs_q + pos_q_ref[0]).astype(cdt)         # q-side input (with pos)
    if separate_kv:
        hs_kv_raw = x_kv_ref[0]                         # (S, E)
        hs_pe_kv = (hs_kv_raw + pos_kv_ref[0]).astype(cdt)  # k-side (with pos)
        hs_kv = hs_kv_raw.astype(cdt)                   # v-side (no pos)
    else:
        hs_pe_kv = hs_pe_q
        hs_kv = hs_q.astype(cdt)

    # Fused all-head projections: lane dim N = E keeps the MXU full.  f32
    # accumulation, f32 bias add, then cast back to the compute dtype so the
    # attention matmuls run at native (bf16) MXU rate.  The 1/sqrt(D) scaling
    # is already folded into wq / bq on the host.
    q = (jnp.dot(hs_pe_q, wq_ref[...], preferred_element_type=jnp.float32)
         + bq_ref[...]).astype(cdt)                     # (Tq, E)
    k = (jnp.dot(hs_pe_kv, wk_ref[...], preferred_element_type=jnp.float32)
         + bk_ref[...]).astype(cdt)                     # (S, E)
    v = (jnp.dot(hs_kv, wv_ref[...], preferred_element_type=jnp.float32)
         + bv_ref[...]).astype(cdt)                     # (S, E)

    # Per-head attention.  Heads stay packed along lanes; static slices.
    # K = D for the score / PV matmuls is inherent to multi-head attention.
    head_outs = []
    for h in range(num_heads):
        sl = slice(h * head_dim, (h + 1) * head_dim)
        qh, kh, vh = q[:, sl], k[:, sl], v[:, sl]       # (Tq, D), (S, D), (S, D)

        # Scores: contract the head dim of both operands — no explicit transpose.
        s = lax.dot_general(qh, kh, (((1,), (1,)), ((), ())),
                            preferred_element_type=jnp.float32)   # (Tq, S) f32

        # Softmax with deferred normalization (normalize Tq*D, not Tq*S).
        m = jnp.max(s, axis=-1, keepdims=True)
        p = jnp.exp(s - m)
        denom = jnp.sum(p, axis=-1, keepdims=True)                # (Tq, 1) f32

        ho = jnp.dot(p.astype(cdt), vh,
                     preferred_element_type=jnp.float32)          # (Tq, D) f32
        ho = ho * pl.reciprocal(denom, approx=True)               # EUP vrcp
        head_outs.append(ho.astype(cdt))

    # Re-pack heads along lanes -> one out-projection matmul with K = E.
    attn = jnp.concatenate(head_outs, axis=-1)                    # (Tq, E)
    out = (jnp.dot(attn, wo_ref[...], preferred_element_type=jnp.float32)
           + bo_ref[...])
    out_ref[0] = out.astype(out_ref.dtype)


def prepare_detr_attention_params(params, num_heads, compute_dtype=jnp.bfloat16):
    """One-time host-side repack — call at parameter-load time, NOT per forward.

    nn.Linear stores W as (out, in); we pre-transpose to (in, out) so the
    kernel does plain x @ W, fold the 1/sqrt(D) query scaling into wq/bq in
    f32, and cast weights to the MXU compute dtype (bf16 recommended on
    v5e/v6e/v7x).  Biases stay f32 (added to the f32 matmul accumulator).
    """
    E = params["q_w"].shape[0]
    D = E // num_heads
    scaling = float(D) ** -0.5
    f32 = jnp.float32
    return {
        "wq": (params["q_w"].astype(f32) * scaling).T.astype(compute_dtype),
        "wk": params["k_w"].astype(f32).T.astype(compute_dtype),
        "wv": params["v_w"].astype(f32).T.astype(compute_dtype),
        "wo": params["o_w"].astype(f32).T.astype(compute_dtype),
        "bq": (params["q_b"].astype(f32) * scaling).reshape(1, E),
        "bk": params["k_b"].astype(f32).reshape(1, E),
        "bv": params["v_b"].astype(f32).reshape(1, E),
        "bo": params["o_b"].astype(f32).reshape(1, E),
    }


def detr_attention_pallas(hidden_states, position_embeddings, prepared, num_heads,
                          *, q_tile=512):
    """Pallas implementation of DetrAttention.forward (self-attention, no mask)."""
    B, T, E = hidden_states.shape
    H = num_heads
    D = E // H
    assert D * H == E, "embed_dim must be divisible by num_heads"
    cdt = prepared["wq"].dtype

    # Query tiling: bounds the (Tq, S) softmax working set and exposes a second
    # parallel grid axis (both v7x TensorCores get work even at batch 1-2).
    q_tile = int(q_tile)
    if q_tile >= T:
        q_tile = T
    else:
        q_tile = max(8, (q_tile // 8) * 8)
    n_q = pl.cdiv(T, q_tile)
    separate_kv = n_q > 1

    x_q_spec = pl.BlockSpec((1, q_tile, E), lambda b, qi: (b, qi, 0))
    x_kv_spec = pl.BlockSpec((1, T, E), lambda b, qi: (b, 0, 0))
    # Constant index_maps -> weights/biases DMA'd once, resident across grid.
    w_spec = pl.BlockSpec((E, E), lambda b, qi: (0, 0))
    b_spec = pl.BlockSpec((1, E), lambda b, qi: (0, 0))
    out_spec = pl.BlockSpec((1, q_tile, E), lambda b, qi: (b, qi, 0))

    in_specs = [x_q_spec, x_q_spec]
    inputs = [hidden_states, position_embeddings]
    if separate_kv:
        in_specs += [x_kv_spec, x_kv_spec]
        inputs += [hidden_states, position_embeddings]
    in_specs += [w_spec, b_spec, w_spec, b_spec, w_spec, b_spec, w_spec, b_spec]
    inputs += [prepared["wq"], prepared["bq"], prepared["wk"], prepared["bk"],
               prepared["wv"], prepared["bv"], prepared["wo"], prepared["bo"]]

    kernel = functools.partial(_detr_attention_kernel, H, D, cdt, separate_kv)

    out = pl.pallas_call(
        kernel,
        out_shape=jax.ShapeDtypeStruct((B, T, E), hidden_states.dtype),
        grid_spec=pltpu.PrefetchScalarGridSpec(
            num_scalar_prefetch=0,
            grid=(B, n_q),
            in_specs=in_specs,
            out_specs=out_spec,
        ),
        compiler_params=pltpu.CompilerParams(
            dimension_semantics=("parallel", "parallel"),
            vmem_limit_bytes=64 * 1024 * 1024),
    )(*inputs)

    # Matches torch forward return signature: (attn_output, attn_weights_reshaped)
    return out, None


def detr_attention_ref(hidden_states, position_embeddings, params, num_heads):
    """Pure-JAX reference mirroring the PyTorch forward (self-attn, no mask, eval)."""
    B, T, E = hidden_states.shape
    D = E // num_heads
    scaling = float(D) ** -0.5
    hs_pe = hidden_states + position_embeddings

    def lin(x, w, b):
        return jnp.einsum("bte,oe->bto", x, w) + b

    q = lin(hs_pe, params["q_w"], params["q_b"]) * scaling
    k = lin(hs_pe, params["k_w"], params["k_b"])
    v = lin(hidden_states, params["v_w"], params["v_b"])

    def split(x):
        return x.reshape(B, T, num_heads, D).transpose(0, 2, 1, 3)  # (B,H,T,D)

    qh, kh, vh = split(q), split(k), split(v)
    s = jnp.einsum("bhtd,bhsd->bhts", qh, kh)
    p = jax.nn.softmax(s, axis=-1)
    o = jnp.einsum("bhts,bhsd->bhtd", p, vh)
    o = o.transpose(0, 2, 1, 3).reshape(B, T, E)
    return jnp.einsum("bte,oe->bto", o, params["o_w"]) + params["o_b"]


def init_params(key, embed_dim):
    ks = jax.random.split(key, 8)
    std = 0.02
    return {
        "q_w": std * jax.random.normal(ks[0], (embed_dim, embed_dim), jnp.float32),
        "q_b": std * jax.random.normal(ks[1], (embed_dim,), jnp.float32),
        "k_w": std * jax.random.normal(ks[2], (embed_dim, embed_dim), jnp.float32),
        "k_b": std * jax.random.normal(ks[3], (embed_dim,), jnp.float32),
        "v_w": std * jax.random.normal(ks[4], (embed_dim, embed_dim), jnp.float32),
        "v_b": std * jax.random.normal(ks[5], (embed_dim,), jnp.float32),
        "o_w": std * jax.random.normal(ks[6], (embed_dim, embed_dim), jnp.float32),
        "o_b": std * jax.random.normal(ks[7], (embed_dim,), jnp.float32),
    }


if __name__ == "__main__":
    B, T, E, H = 2, 8, 32, 4

    key = jax.random.PRNGKey(0)
    k_x, k_pos, k_p = jax.random.split(key, 3)
    hidden_states = jax.random.normal(k_x, (B, T, E), jnp.float32)
    position_embeddings = jax.random.normal(k_pos, (B, T, E), jnp.float32)
    params = init_params(k_p, E)

    ref = detr_attention_ref(hidden_states, position_embeddings, params, H)

    # f32 compute path: tight correctness check (approx reciprocal ~1e-4 rel).
    prep_f32 = prepare_detr_attention_params(params, H, compute_dtype=jnp.float32)
    out, _ = detr_attention_pallas(hidden_states, position_embeddings, prep_f32, H)
    out = jax.block_until_ready(out)
    assert out.shape == (B, T, E)
    assert jnp.allclose(out, ref, atol=1e-4, rtol=1e-4), "f32 mismatch vs reference"

    # bf16 compute path (recommended default for MXU throughput on v5e/v6e/v7x).
    prep_bf16 = prepare_detr_attention_params(params, H)  # compute_dtype=bf16
    out_bf, _ = detr_attention_pallas(hidden_states, position_embeddings, prep_bf16, H)
    out_bf = jax.block_until_ready(out_bf)
    assert jnp.allclose(out_bf, ref, atol=2e-3, rtol=2e-2), "bf16 mismatch vs reference"

    print("KERNEL_OK")
</pallas_src>

<mosaic_0001>
module attributes {stable_mosaic.version = 11 : i64} {
  func.func @_detr_attention_kernel(%arg0: i32, %arg1: i32, %arg2: memref<1x8x32xf32, #tpu.memory_space<vmem>>, %arg3: memref<1x8x32xf32, #tpu.memory_space<vmem>>, %arg4: memref<32x32xf32, #tpu.memory_space<vmem>>, %arg5: memref<1x32xf32, #tpu.memory_space<vmem>>, %arg6: memref<32x32xf32, #tpu.memory_space<vmem>>, %arg7: memref<1x32xf32, #tpu.memory_space<vmem>>, %arg8: memref<32x32xf32, #tpu.memory_space<vmem>>, %arg9: memref<1x32xf32, #tpu.memory_space<vmem>>, %arg10: memref<32x32xf32, #tpu.memory_space<vmem>>, %arg11: memref<1x32xf32, #tpu.memory_space<vmem>>, %arg12: memref<1x8x32xf32, #tpu.memory_space<vmem>>) attributes {dimension_semantics = [#tpu.dimension_semantics<parallel>, #tpu.dimension_semantics<parallel>], iteration_bounds = array<i64: 2, 1>, scalar_prefetch = 0 : i64, scratch_operands = 0 : i64, tpu.core_type = #tpu.core_type<tc>, window_params = [{transform_indices = @transform_0, window_bounds = array<i64: 1, 8, 32>}, {transform_indices = @transform_1, window_bounds = array<i64: 1, 8, 32>}, {pipeline_mode = #tpu.pipeline_mode<synchronous>, transform_indices = @transform_2, window_bounds = array<i64: 32, 32>}, {pipeline_mode = #tpu.pipeline_mode<synchronous>, transform_indices = @transform_3, window_bounds = array<i64: 1, 32>}, {pipeline_mode = #tpu.pipeline_mode<synchronous>, transform_indices = @transform_4, window_bounds = array<i64: 32, 32>}, {pipeline_mode = #tpu.pipeline_mode<synchronous>, transform_indices = @transform_5, window_bounds = array<i64: 1, 32>}, {pipeline_mode = #tpu.pipeline_mode<synchronous>, transform_indices = @transform_6, window_bounds = array<i64: 32, 32>}, {pipeline_mode = #tpu.pipeline_mode<synchronous>, transform_indices = @transform_7, window_bounds = array<i64: 1, 32>}, {pipeline_mode = #tpu.pipeline_mode<synchronous>, transform_indices = @transform_8, window_bounds = array<i64: 32, 32>}, {pipeline_mode = #tpu.pipeline_mode<synchronous>, transform_indices = @transform_9, window_bounds = array<i64: 1, 32>}, {transform_indices = @transform_10, window_bounds = array<i64: 1, 8, 32>}]} {
    %c0 = arith.constant 0 : index
    %c0_0 = arith.constant 0 : index
    %c0_1 = arith.constant 0 : index
    %0 = vector.load %arg2[%c0, %c0_0, %c0_1] : memref<1x8x32xf32, #tpu.memory_space<vmem>>, vector<1x8x32xf32>
    %1 = vector.shape_cast %0 : vector<1x8x32xf32> to vector<8x32xf32>
    %c0_2 = arith.constant 0 : index
    %c0_3 = arith.constant 0 : index
    %c0_4 = arith.constant 0 : index
    %2 = vector.load %arg3[%c0_2, %c0_3, %c0_4] : memref<1x8x32xf32, #tpu.memory_space<vmem>>, vector<1x8x32xf32>
    %3 = vector.shape_cast %2 : vector<1x8x32xf32> to vector<8x32xf32>
    %4 = arith.addf %1, %3 : vector<8x32xf32>
    %c0_5 = arith.constant 0 : index
    %c0_6 = arith.constant 0 : index
    %5 = vector.load %arg4[%c0_5, %c0_6] : memref<32x32xf32, #tpu.memory_space<vmem>>, vector<32x32xf32>
    %cst = arith.constant dense<0.000000e+00> : vector<8x32xf32>
    %6 = tpu.matmul %4, %5, %cst {dimension_numbers = #tpu.dot_dimension_numbers<[1], [0], [0], [1], [0, 0, 1, 1], [], []>} : vector<8x32xf32>, vector<32x32xf32>, vector<8x32xf32> -> vector<8x32xf32>
    %c0_7 = arith.constant 0 : index
    %c0_8 = arith.constant 0 : index
    %7 = vector.load %arg5[%c0_7, %c0_8] : memref<1x32xf32, #tpu.memory_space<vmem>>, vector<1x32xf32>
    %8 = vector.broadcast %7 : vector<1x32xf32> to vector<8x32xf32>
    %9 = arith.addf %6, %8 : vector<8x32xf32>
    %c0_9 = arith.constant 0 : index
    %c0_10 = arith.constant 0 : index
    %10 = vector.load %arg6[%c0_9, %c0_10] : memref<32x32xf32, #tpu.memory_space<vmem>>, vector<32x32xf32>
    %cst_11 = arith.constant dense<0.000000e+00> : vector<8x32xf32>
    %11 = tpu.matmul %4, %10, %cst_11 {dimension_numbers = #tpu.dot_dimension_numbers<[1], [0], [0], [1], [0, 0, 1, 1], [], []>} : vector<8x32xf32>, vector<32x32xf32>, vector<8x32xf32> -> vector<8x32xf32>
    %c0_12 = arith.constant 0 : index
    %c0_13 = arith.constant 0 : index
    %12 = vector.load %arg7[%c0_12, %c0_13] : memref<1x32xf32, #tpu.memory_space<vmem>>, vector<1x32xf32>
    %13 = vector.broadcast %12 : vector<1x32xf32> to vector<8x32xf32>
    %14 = arith.addf %11, %13 : vector<8x32xf32>
    %c0_14 = arith.constant 0 : index
    %c0_15 = arith.constant 0 : index
    %15 = vector.load %arg8[%c0_14, %c0_15] : memref<32x32xf32, #tpu.memory_space<vmem>>, vector<32x32xf32>
    %cst_16 = arith.constant dense<0.000000e+00> : vector<8x32xf32>
    %16 = tpu.matmul %1, %15, %cst_16 {dimension_numbers = #tpu.dot_dimension_numbers<[1], [0], [0], [1], [0, 0, 1, 1], [], []>} : vector<8x32xf32>, vector<32x32xf32>, vector<8x32xf32> -> vector<8x32xf32>
    %c0_17 = arith.constant 0 : index
    %c0_18 = arith.constant 0 : index
    %17 = vector.load %arg9[%c0_17, %c0_18] : memref<1x32xf32, #tpu.memory_space<vmem>>, vector<1x32xf32>
    %18 = vector.broadcast %17 : vector<1x32xf32> to vector<8x32xf32>
    %19 = arith.addf %16, %18 : vector<8x32xf32>
    %20 = vector.extract_strided_slice %9 {offsets = [0, 0], sizes = [8, 8], strides = [1, 1]} : vector<8x32xf32> to vector<8x8xf32>
    %21 = vector.extract_strided_slice %14 {offsets = [0, 0], sizes = [8, 8], strides = [1, 1]} : vector<8x32xf32> to vector<8x8xf32>
    %22 = vector.extract_strided_slice %19 {offsets = [0, 0], sizes = [8, 8], strides = [1, 1]} : vector<8x32xf32> to vector<8x8xf32>
    %cst_19 = arith.constant dense<0.000000e+00> : vector<8x8xf32>
    %23 = tpu.matmul %20, %21, %cst_19 {dimension_numbers = #tpu.dot_dimension_numbers<[1], [1], [0], [0], [0, 0, 1, 0], [], []>} : vector<8x8xf32>, vector<8x8xf32>, vector<8x8xf32> -> vector<8x8xf32>
    %cst_20 = arith.constant dense<0xFF800000> : vector<8xf32>
    %24 = vector.multi_reduction <maximumf>, %23, %cst_20 [1] : vector<8x8xf32> to vector<8xf32>
    %25 = vector.shape_cast %24 : vector<8xf32> to vector<8x1xf32>
    %26 = vector.broadcast %25 : vector<8x1xf32> to vector<8x8xf32>
    %27 = arith.subf %23, %26 : vector<8x8xf32>
    %28 = math.exp %27 : vector<8x8xf32>
    %cst_21 = arith.constant dense<0.000000e+00> : vector<8xf32>
    %29 = vector.multi_reduction <add>, %28, %cst_21 [1] : vector<8x8xf32> to vector<8xf32>
    %30 = vector.shape_cast %29 : vector<8xf32> to vector<8x1xf32>
    %cst_22 = arith.constant dense<0.000000e+00> : vector<8x8xf32>
    %31 = tpu.matmul %28, %22, %cst_22 {dimension_numbers = #tpu.dot_dimension_numbers<[1], [0], [0], [1], [0, 0, 1, 1], [], []>} : vector<8x8xf32>, vector<8x8xf32>, vector<8x8xf32> -> vector<8x8xf32>
    %32 = tpu.reciprocal %30 {approx = true} : vector<8x1xf32> -> vector<8x1xf32>
    %33 = vector.broadcast %32 : vector<8x1xf32> to vector<8x8xf32>
    %34 = arith.mulf %31, %33 : vector<8x8xf32>
    %35 = vector.extract_strided_slice %9 {offsets = [0, 8], sizes = [8, 8], strides = [1, 1]} : vector<8x32xf32> to vector<8x8xf32>
    %36 = vector.extract_strided_slice %14 {offsets = [0, 8], sizes = [8, 8], strides = [1, 1]} : vector<8x32xf32> to vector<8x8xf32>
    %37 = vector.extract_strided_slice %19 {offsets = [0, 8], sizes = [8, 8], strides = [1, 1]} : vector<8x32xf32> to vector<8x8xf32>
    %cst_23 = arith.constant dense<0.000000e+00> : vector<8x8xf32>
    %38 = tpu.matmul %35, %36, %cst_23 {dimension_numbers = #tpu.dot_dimension_numbers<[1], [1], [0], [0], [0, 0, 1, 0], [], []>} : vector<8x8xf32>, vector<8x8xf32>, vector<8x8xf32> -> vector<8x8xf32>
    %cst_24 = arith.constant dense<0xFF800000> : vector<8xf32>
    %39 = vector.multi_reduction <maximumf>, %38, %cst_24 [1] : vector<8x8xf32> to vector<8xf32>
    %40 = vector.shape_cast %39 : vector<8xf32> to vector<8x1xf32>
    %41 = vector.broadcast %40 : vector<8x1xf32> to vector<8x8xf32>
    %42 = arith.subf %38, %41 : vector<8x8xf32>
    %43 = math.exp %42 : vector<8x8xf32>
    %cst_25 = arith.constant dense<0.000000e+00> : vector<8xf32>
    %44 = vector.multi_reduction <add>, %43, %cst_25 [1] : vector<8x8xf32> to vector<8xf32>
    %45 = vector.shape_cast %44 : vector<8xf32> to vector<8x1xf32>
    %cst_26 = arith.constant dense<0.000000e+00> : vector<8x8xf32>
    %46 = tpu.matmul %43, %37, %cst_26 {dimension_numbers = #tpu.dot_dimension_numbers<[1], [0], [0], [1], [0, 0, 1, 1], [], []>} : vector<8x8xf32>, vector<8x8xf32>, vector<8x8xf32> -> vector<8x8xf32>
    %47 = tpu.reciprocal %45 {approx = true} : vector<8x1xf32> -> vector<8x1xf32>
    %48 = vector.broadcast %47 : vector<8x1xf32> to vector<8x8xf32>
    %49 = arith.mulf %46, %48 : vector<8x8xf32>
    %50 = vector.extract_strided_slice %9 {offsets = [0, 16], sizes = [8, 8], strides = [1, 1]} : vector<8x32xf32> to vector<8x8xf32>
    %51 = vector.extract_strided_slice %14 {offsets = [0, 16], sizes = [8, 8], strides = [1, 1]} : vector<8x32xf32> to vector<8x8xf32>
    %52 = vector.extract_strided_slice %19 {offsets = [0, 16], sizes = [8, 8], strides = [1, 1]} : vector<8x32xf32> to vector<8x8xf32>
    %cst_27 = arith.constant dense<0.000000e+00> : vector<8x8xf32>
    %53 = tpu.matmul %50, %51, %cst_27 {dimension_numbers = #tpu.dot_dimension_numbers<[1], [1], [0], [0], [0, 0, 1, 0], [], []>} : vector<8x8xf32>, vector<8x8xf32>, vector<8x8xf32> -> vector<8x8xf32>
    %cst_28 = arith.constant dense<0xFF800000> : vector<8xf32>
    %54 = vector.multi_reduction <maximumf>, %53, %cst_28 [1] : vector<8x8xf32> to vector<8xf32>
    %55 = vector.shape_cast %54 : vector<8xf32> to vector<8x1xf32>
    %56 = vector.broadcast %55 : vector<8x1xf32> to vector<8x8xf32>
    %57 = arith.subf %53, %56 : vector<8x8xf32>
    %58 = math.exp %57 : vector<8x8xf32>
    %cst_29 = arith.constant dense<0.000000e+00> : vector<8xf32>
    %59 = vector.multi_reduction <add>, %58, %cst_29 [1] : vector<8x8xf32> to vector<8xf32>
    %60 = vector.shape_cast %59 : vector<8xf32> to vector<8x1xf32>
    %cst_30 = arith.constant dense<0.000000e+00> : vector<8x8xf32>
    %61 = tpu.matmul %58, %52, %cst_30 {dimension_numbers = #tpu.dot_dimension_numbers<[1], [0], [0], [1], [0, 0, 1, 1], [], []>} : vector<8x8xf32>, vector<8x8xf32>, vector<8x8xf32> -> vector<8x8xf32>
    %62 = tpu.reciprocal %60 {approx = true} : vector<8x1xf32> -> vector<8x1xf32>
    %63 = vector.broadcast %62 : vector<8x1xf32> to vector<8x8xf32>
    %64 = arith.mulf %61, %63 : vector<8x8xf32>
    %65 = vector.extract_strided_slice %9 {offsets = [0, 24], sizes = [8, 8], strides = [1, 1]} : vector<8x32xf32> to vector<8x8xf32>
    %66 = vector.extract_strided_slice %14 {offsets = [0, 24], sizes = [8, 8], strides = [1, 1]} : vector<8x32xf32> to vector<8x8xf32>
    %67 = vector.extract_strided_slice %19 {offsets = [0, 24], sizes = [8, 8], strides = [1, 1]} : vector<8x32xf32> to vector<8x8xf32>
    %cst_31 = arith.constant dense<0.000000e+00> : vector<8x8xf32>
    %68 = tpu.matmul %65, %66, %cst_31 {dimension_numbers = #tpu.dot_dimension_numbers<[1], [1], [0], [0], [0, 0, 1, 0], [], []>} : vector<8x8xf32>, vector<8x8xf32>, vector<8x8xf32> -> vector<8x8xf32>
    %cst_32 = arith.constant dense<0xFF800000> : vector<8xf32>
    %69 = vector.multi_reduction <maximumf>, %68, %cst_32 [1] : vector<8x8xf32> to vector<8xf32>
    %70 = vector.shape_cast %69 : vector<8xf32> to vector<8x1xf32>
    %71 = vector.broadcast %70 : vector<8x1xf32> to vector<8x8xf32>
    %72 = arith.subf %68, %71 : vector<8x8xf32>
    %73 = math.exp %72 : vector<8x8xf32>
    %cst_33 = arith.constant dense<0.000000e+00> : vector<8xf32>
    %74 = vector.multi_reduction <add>, %73, %cst_33 [1] : vector<8x8xf32> to vector<8xf32>
    %75 = vector.shape_cast %74 : vector<8xf32> to vector<8x1xf32>
    %cst_34 = arith.constant dense<0.000000e+00> : vector<8x8xf32>
    %76 = tpu.matmul %73, %67, %cst_34 {dimension_numbers = #tpu.dot_dimension_numbers<[1], [0], [0], [1], [0, 0, 1, 1], [], []>} : vector<8x8xf32>, vector<8x8xf32>, vector<8x8xf32> -> vector<8x8xf32>
    %77 = tpu.reciprocal %75 {approx = true} : vector<8x1xf32> -> vector<8x1xf32>
    %78 = vector.broadcast %77 : vector<8x1xf32> to vector<8x8xf32>
    %79 = arith.mulf %76, %78 : vector<8x8xf32>
    %80 = tpu.concatenate %34, %49, %64, %79 in 1 : vector<8x8xf32>, vector<8x8xf32>, vector<8x8xf32>, vector<8x8xf32> -> vector<8x32xf32>
    %c0_35 = arith.constant 0 : index
    %c0_36 = arith.constant 0 : index
    %81 = vector.load %arg10[%c0_35, %c0_36] : memref<32x32xf32, #tpu.memory_space<vmem>>, vector<32x32xf32>
    %cst_37 = arith.constant dense<0.000000e+00> : vector<8x32xf32>
    %82 = tpu.matmul %80, %81, %cst_37 {dimension_numbers = #tpu.dot_dimension_numbers<[1], [0], [0], [1], [0, 0, 1, 1], [], []>} : vector<8x32xf32>, vector<32x32xf32>, vector<8x32xf32> -> vector<8x32xf32>
    %c0_38 = arith.constant 0 : index
    %c0_39 = arith.constant 0 : index
    %83 = vector.load %arg11[%c0_38, %c0_39] : memref<1x32xf32, #tpu.memory_space<vmem>>, vector<1x32xf32>
    %84 = vector.broadcast %83 : vector<1x32xf32> to vector<8x32xf32>
    %85 = arith.addf %82, %84 : vector<8x32xf32>
    %c0_40 = arith.constant 0 : index
    %c0_41 = arith.constant 0 : index
    %c0_42 = arith.constant 0 : index
    %86 = vector.load %arg12[%c0_40, %c0_41, %c0_42] : memref<1x8x32xf32, #tpu.memory_space<vmem>>, vector<1x8x32xf32>
    %87 = vector.shape_cast %86 : vector<1x8x32xf32> to vector<8x32xf32>
    %88 = vector.shape_cast %85 : vector<8x32xf32> to vector<1x8x32xf32>
    tpu.vector_store %arg12[%c0_40, %c0_41, %c0_42], %88 {strides = array<i32>} : memref<1x8x32xf32, #tpu.memory_space<vmem>>, vector<1x8x32xf32>,
    return
  }
  func.func @transform_0(%arg0: i32, %arg1: i32) -> (i32, i32, i32) {
    %c0_i32 = arith.constant 0 : i32
    %c0_i32_0 = arith.constant 0 : i32
    return %arg0, %arg1, %c0_i32 : i32, i32, i32
  }
  func.func @transform_1(%arg0: i32, %arg1: i32) -> (i32, i32, i32) {
    %c0_i32 = arith.constant 0 : i32
    %c0_i32_0 = arith.constant 0 : i32
    return %arg0, %arg1, %c0_i32 : i32, i32, i32
  }
  func.func @transform_2(%arg0: i32, %arg1: i32) -> (i32, i32) {
    %c0_i32 = arith.constant 0 : i32
    %c0_i32_0 = arith.constant 0 : i32
    %c0_i32_1 = arith.constant 0 : i32
    return %c0_i32, %c0_i32_0 : i32, i32
  }
  func.func @transform_3(%arg0: i32, %arg1: i32) -> (i32, i32) {
    %c0_i32 = arith.constant 0 : i32
    %c0_i32_0 = arith.constant 0 : i32
    %c0_i32_1 = arith.constant 0 : i32
    return %c0_i32, %c0_i32_0 : i32, i32
  }
  func.func @transform_4(%arg0: i32, %arg1: i32) -> (i32, i32) {
    %c0_i32 = arith.constant 0 : i32
    %c0_i32_0 = arith.constant 0 : i32
    %c0_i32_1 = arith.constant 0 : i32
    return %c0_i32, %c0_i32_0 : i32, i32
  }
  func.func @transform_5(%arg0: i32, %arg1: i32) -> (i32, i32) {
    %c0_i32 = arith.constant 0 : i32
    %c0_i32_0 = arith.constant 0 : i32
    %c0_i32_1 = arith.constant 0 : i32
    return %c0_i32, %c0_i32_0 : i32, i32
  }
  func.func @transform_6(%arg0: i32, %arg1: i32) -> (i32, i32) {
    %c0_i32 = arith.constant 0 : i32
    %c0_i32_0 = arith.constant 0 : i32
    %c0_i32_1 = arith.constant 0 : i32
    return %c0_i32, %c0_i32_0 : i32, i32
  }
  func.func @transform_7(%arg0: i32, %arg1: i32) -> (i32, i32) {
    %c0_i32 = arith.constant 0 : i32
    %c0_i32_0 = arith.constant 0 : i32
    %c0_i32_1 = arith.constant 0 : i32
    return %c0_i32, %c0_i32_0 : i32, i32
  }
  func.func @transform_8(%arg0: i32, %arg1: i32) -> (i32, i32) {
    %c0_i32 = arith.constant 0 : i32
    %c0_i32_0 = arith.constant 0 : i32
    %c0_i32_1 = arith.constant 0 : i32
    return %c0_i32, %c0_i32_0 : i32, i32
  }
  func.func @transform_9(%arg0: i32, %arg1: i32) -> (i32, i32) {
    %c0_i32 = arith.constant 0 : i32
    %c0_i32_0 = arith.constant 0 : i32
    %c0_i32_1 = arith.constant 0 : i32
    return %c0_i32, %c0_i32_0 : i32, i32
  }
  func.func @transform_10(%arg0: i32, %arg1: i32) -> (i32, i32, i32) {
    %c0_i32 = arith.constant 0 : i32
    %c0_i32_0 = arith.constant 0 : i32
    return %arg0, %arg1, %c0_i32 : i32, i32, i32
  }
}

</mosaic_0001>

<bundles_post_ra>
// kernel: tpu_custom_call.1
= control target key start
LH: loop header
LB: loop body
LE: loop exit
PB: predicated region body
PF: predicated region fallthrough
CT: control target
= control target key end

     0   :  { %s1817_s0 = inlined_call_operand.hbm [shape: f32[2,8,32], index: 0, kind: input, shape index: {}]   ;;  %s1818_s1 = inlined_call_operand.hbm [shape: f32[2,8,32], index: 1, kind: input, shape index: {}]   ;;  %s1819_s2 = inlined_call_operand.hbm [shape: f32[32,32], index: 2, kind: input, shape index: {}]   ;;  %s1820_s3 = inlined_call_operand.vmem [shape: f32[1,32], index: 3, kind: input, shape index: {}]   ;;  %s1821_s4 = inlined_call_operand.hbm [shape: f32[32,32], index: 4, kind: input, shape index: {}]   ;;  %s1822_s5 = inlined_call_operand.vmem [shape: f32[1,32], index: 5, kind: input, shape index: {}]   ;;  %s1823_s6 = inlined_call_operand.hbm [shape: f32[32,32], index: 6, kind: input, shape index: {}]   ;;  %s1824_s7 = inlined_call_operand.vmem [shape: f32[1,32], index: 7, kind: input, shape index: {}]   ;;  %s1825_s8 = inlined_call_operand.hbm [shape: f32[32,32], index: 8, kind: input, shape index: {}]   ;;  %s1826_s9 = inlined_call_operand.vmem [shape: f32[1,32], index: 9, kind: input, shape index: {}]   ;;  %s1827_s10 = inlined_call_operand.hbm [shape: f32[2,8,32], index: 10, kind: output, shape index: {}]  }
   0x1   :  { %1833 = sst [smem:[#allocation26_spill]] %s1819_s2 }
   0x2   :  { %1834 = sst [smem:[#allocation27_spill]] %s1821_s4 }
   0x3   :  { %1835 = sst [smem:[#allocation28_spill]] %s1823_s6 }
   0x4   :  { %1836 = sst [smem:[#allocation29_spill]] %s1825_s8 }
   0x5   :  { %1837 = sst [smem:[#allocation30_spill]] %s1826_s9 }
   0x6   :  { %15 = vsyncpa [#allocation3], 0 }
   0x7   :  { %17 = vsyncpa [#allocation3 + $0x1], 0 }
   0x8   :  { %18 = vsyncpa [#allocation6], 0 }
   0x9   :  { %20 = vsyncpa [#allocation6 + $0x1], 0 }
   0xa   :  { %21 = vsyncpa [#allocation9], 0 }
   0xb   :  { %22 = vsyncpa [#allocation12], 0 }
   0xc   :  { %23 = vsyncpa [#allocation4], 0 }
   0xd   :  { %25 = vsyncpa [#allocation4 + $0x1], 0  ;;  %s1584_s13 = smov 0   ;;  %s1586_s14 = smov 0  }
   0xe   :  { %s1588_s15 = smov 0   ;;  %s1590_s16 = smov 0  }
   0xf   :  { %s1592_s17 = smov 0   ;;  %s1594_s18 = smov 0  }
  0x10 LB: > { %1838 = sst [smem:[#allocation20_spill]] %s1495_s13  ;;  %s1615_s19 = sadd.s32 4294967295, %s1515_s18   ;;  %s1515_s18 = sphi %s1594_s18, %s31_s18   ;;  %s1511_s17 = sphi %s1592_s17, %s1860_s17   ;;  %s1507_s16 = sphi %s1590_s16, %s1859_s16   ;;  %s1503_s15 = sphi %s1588_s15, %s1858_s15   ;;  %s1499_s14 = sphi %s1586_s14, %s1862_s14   ;;  %s1495_s13 = sphi %s1584_s13, %s1861_s13  }
  0x11   : > { %1839 = sst [smem:[#allocation21_spill]] %s1503_s15  ;;  %p1063_p0 = scmp.ge.s32.totalorder %s1515_s18, 1 }
  0x12   : > { %1840 = sst [smem:[#allocation22_spill]] %s1511_s17  ;;  %p66_p1 = scmp.eq.s32.totalorder %s1615_s19, 0 }
  0x13   : > { %p300_p2 = scmp.lt.s32.totalorder %s1515_s18, 3  ;;  %s1841_s2 = sld [smem:[#allocation26_spill]] }
  0x14   : > { %s1517_s24 = smov [#allocation7]   ;;  %p1068_p6 = scmp.ge.s32.totalorder %s1515_s18, 2 }
  0x15   : > { %p1623_p3 = pnand %p1063_p0, %p300_p2  ;;  %s313_s25 = sshll.u32 %s1517_s24, 4  ;;  %s314_s25 = int_to_ptr.vmem [resolvable:$true] %s313_s25 }
  0x16   : > { %s1844_s4 = sld [smem:[#allocation27_spill]]  ;;  %s1518_s30 = smov 128  }
  0x17   : > { %p1123_p4 = pneg %p1623_p3  ;;  %s1519_s11 = smov 8  }
  0x18   : > { %s1520_s12 = smov [#allocation8]   ;;  %s1845_s6 = sld [smem:[#allocation28_spill]] }
  0x19   : > { %s311_s22 = sshll.u32 %s1841_s2, 4  ;;  %p1631_p5 = pnand %p1123_p4, %p66_p1  ;;  %s312_s22 = int_to_ptr.hbm [resolvable:$true] %s311_s22 }
  0x1a   : > { %s330_s20 = sshll.u32 %s1520_s12, 4  ;;  %s1846_s8 = sld [smem:[#allocation29_spill]]  ;;  %s331_s20 = int_to_ptr.vmem [resolvable:$true] %s330_s20 }
  0x1b   : > { %1126 = dma.hbm_to_vmem [thread:$0]  (!%p1631_p5), %s312_s22, 512, %s314_s25, [#allocation6], %s1518_s30, %s1518_s30, %s1519_s11  }
  0x1c   : > { %s328_s29 = sshll.u32 %s1844_s4, 4  ;;  %s1521_s25 = smov [#allocation10]   ;;  %s329_s29 = int_to_ptr.hbm [resolvable:$true] %s328_s29 }
  0x1d   : > { %1129 = dma.hbm_to_vmem [thread:$0]  (!%p1631_p5), %s329_s29, 512, %s331_s20, [#allocation9], %s1518_s30, %s1518_s30, %s1519_s11  }
  0x1e   : > { %s345_s2 = sshll.u32 %s1845_s6, 4  ;;  %s347_s4 = sshll.u32 %s1521_s25, 4  ;;  %s346_s2 = int_to_ptr.hbm [resolvable:$true] %s345_s2  ;;  %s348_s4 = int_to_ptr.vmem [resolvable:$true] %s347_s4 }
  0x1f   : > { %1132 = dma.hbm_to_vmem [thread:$0]  (!%p1631_p5), %s346_s2, 512, %s348_s4, [#allocation9], %s1518_s30, %s1518_s30, %s1519_s11  }
  0x20   : > { %s362_s22 = sshll.u32 %s1846_s8, 4  ;;  %s1522_s12 = smov [#allocation11]   ;;  %s363_s22 = int_to_ptr.hbm [resolvable:$true] %s362_s22 }
  0x21   : > { %s364_s21 = sshll.u32 %s1522_s12, 4  ;;  %s1062_s29 = sadd.s32 4294967294, %s1515_s18   ;;  %s365_s21 = int_to_ptr.vmem [resolvable:$true] %s364_s21 }
  0x22   : > { %1135 = dma.hbm_to_vmem [thread:$0]  (!%p1631_p5), %s363_s22, 512, %s365_s21, [#allocation12], %s1518_s30, %s1518_s30, %s1519_s11  }
  0x23   : > { %s43_s20 = sadd.s32 1, %s1511_s17  ;;  %s52_s24 = sadd.s32 1, %s1503_s15 }
  0x24   : > { %p45_p7 = scmp.ge.s32.totalorder %s43_s20, 2  ;;  %p59_p8 = scmp.ne.s32.totalorder %s1503_s15, %s1499_s14 }
  0x25   : > { %p60_p9 = scmp.eq.s32.totalorder %s1515_s18, 0  ;;  %p65_p11 = scmp.ne.s32.totalorder %s1499_s14, %s1495_s13 }
  0x26   : > { %s1864_s20 = smov (%p45_p7, %s43_s20), 0  ;;  %p287_p12 = scmp.eq.s32.totalorder %s1615_s19, 1 }
  0x27   : > { %1847 = sst [smem:[#allocation23_spill]] %s1864_s20  ;;  %p1661_p10 = por %p60_p9, %p59_p8 }
  0x28   : > { %s47_s4 = ssub.s32 %s1511_s17, %s1864_s20  ;;  %p1672_p0 = por %p66_p1, %p65_p11 }
  0x29   : > { %p50_p13 = scmp.eq.s32.totalorder %s47_s4, 0  ;;  %p1676_p2 = por %p287_p12, %p59_p8 }
  0x2a   : > { %p293_p4 = scmp.eq.s32.totalorder %s1062_s29, 1  ;;  %p1151_p7 = scmp.lt.s32.totalorder %s1515_s18, 2 }
  0x2b   : > { %s1681_s11 = scalar_select %p50_p13, %s1503_s15, %s52_s24  }
  0x2c   : > { %p1683_p5 = por %p293_p4, %p65_p11  ;;  %s381_s28 = sand.u32 1, %s1503_s15  }
  0x2d   : > { %1851 = sst [smem:[#allocation24_spill]] %s1681_s11  ;;  %s1070_s22 = sshll.u32 %s1511_s17, 3 }
  0x2e   : > { %s1852_s27 = scalar_select %p1683_p5, 1, 0 }
  0x2f   : > { %s1069_s25 = sshll.u32 %s381_s28, 3  ;;  %s390_s4 = scalar_lea.hbm %s1817_s0, %s1070_s22 }
  0x30   : > { %1853 = sst [smem:[#allocation25_spill]] %s1852_s27  ;;  %s392_s6 = sshll.u32 %s390_s4, 4  ;;  %s393_s6 = int_to_ptr.hbm [resolvable:$true] %s392_s6 }
  0x31   : > { %s385_s8 = scalar_lea.vmem [#allocation2], %s1069_s25  ;;  %p1137_p8 = pnand %p1151_p7, %p1661_p10 }
  0x32   : > { %s394_s20 = sshll.u32 %s385_s8, 4  ;;  %s410_s11 = scalar_lea.hbm %s1818_s1, %s1070_s22  ;;  %s395_s20 = int_to_ptr.vmem [resolvable:$true] %s394_s20 }
  0x33   : > { %s401_s27 = sand.u32 1, %s1515_s18   ;;  %s382_s13 = scalar_lea.sflag [#allocation3], %s381_s28 }
  0x34   : > { %1139 = dma.hbm_to_vmem [thread:$0]  (!%p1137_p8), %s393_s6, 128, %s395_s20, %s382_s13  }
  0x35   : > { %s412_s17 = sshll.u32 %s410_s11, 4  ;;  %s405_s15 = scalar_lea.vmem [#allocation5], %s1069_s25  ;;  %s413_s17 = int_to_ptr.hbm [resolvable:$true] %s412_s17 }
  0x36   : > { %s414_s9 = sshll.u32 %s405_s15, 4  ;;  %s402_s12 = scalar_lea.sflag [#allocation6], %s401_s27  ;;  %s415_s9 = int_to_ptr.vmem [resolvable:$true] %s414_s9 }
  0x37   : > { %1142 = dma.hbm_to_vmem [thread:$0]  (!%p1137_p8), %s413_s17, 128, %s415_s9, %s402_s12  }
  0x38   : > { %423 = sbr.rel (%p1623_p3) target bundleno = 986 (0x3da), region = 60  ;;  %s1702_s8 = sand.u32 (!%p1623_p3), 1, %s1499_s14  }
  0x39   : > { %s1705_s2 = sshll.u32 (!%p1623_p3), %s1702_s8, 3  ;;  %s426_s6 = scalar_lea.sflag (!%p1623_p3), [#allocation3], %s1702_s8 }
  0x3a   : > { %s429_s13 = scalar_lea.vmem (!%p1623_p3), [#allocation2], %s1705_s2 }
  0x3d   : > { %1470 = dma.done.wait (%p1672_p0), %s426_s6, 128  }
  0x3e   : > { %1472 = vsyncadd (%p1672_p0), %s426_s6, 4294967168  ;;  %s435_s9 = sand.u32 1, %s1615_s19   ;;  %s439_s17 = scalar_lea.vmem [#allocation5], %s1705_s2 }
  0x3f   : > { %s436_s15 = scalar_lea.sflag [#allocation6], %s435_s9 }
  0x40   : > { %1474 = dma.done.wait (%p1672_p0), %s436_s15, 128  }
  0x41   : > { %1476 = vsyncadd (%p1672_p0), %s436_s15, 4294967168 }
  0x42   : > { %1478 = dma.done.wait (%p66_p1), [#allocation6], 512  }
  0x43   : > { %1480 = vsyncadd (%p66_p1), [#allocation6], 4294966784 }
  0x44   : > { %1482 = dma.done.wait (%p66_p1), [#allocation9], 1024  }
  0x45   : > { %1484 = vsyncadd (%p66_p1), [#allocation9], 4294966272 }
  0x46   : > { %1486 = dma.done.wait (%p66_p1), [#allocation12], 512  }
  0x47   : > { %1488 = vsyncadd (%p66_p1), [#allocation12], 4294966784  ;;  %v540_v0 = vld [vmem:[#allocation8 + $0x18] sm:$0xff]  ;;  %v539_v1 = vld [vmem:[#allocation8 + $0x10] sm:$0xff]  ;;  %vm513_vm0 = vcmask 261120   ;;  %vm596_vm1 = vcmask 64512  }
  0x48   : > { %v508_v2 = vld [vmem:[#allocation7 + $0x18] sm:$0xff]  ;;  %557 = vmatpush.msra.mxu1 %v540_v0  ;;  %v538_v3 = vld [vmem:[#allocation8 + $0x8] sm:$0xff]  ;;  %v507_v4 = vld [vmem:[#allocation7 + $0x10] sm:$0xff]  ;;  %s1523_s11 = smov 104   ;;  %s1524_s27 = smov 120   ;;  %vm866_vm2 = vcmask 130048  }
  0x49   : > { %529 = vmatpush.msra.mxu0 %v508_v2  ;;  %v506_v5 = vld [vmem:[#allocation7 + $0x8] sm:$0xff]  ;;  %v503_v7 = vld [vmem:[%s439_s17] sm:$0xff]  ;;  %v537_v8 = vld [vmem:[#allocation8] sm:$0xff]  ;;  %s1525_s28 = smov 112   ;;  %s1526_s21 = smov 8   ;;  %vm868_vm3 = vcmask 195584  }
  0x4a   : > { %v502_v6 = vld [vmem:[%s429_s13] sm:$0xff]  ;;  %558 = vmatpush.msra.mxu1 %v539_v1  ;;  %v568_v17 = vld [vmem:[#allocation10 + $0x18] sm:$0xff]  ;;  %v567_v18 = vld [vmem:[#allocation10 + $0x10] sm:$0xff]  ;;  %s1527_s4 = smov 24   ;;  %s1528_s29 = smov 16  }
  0x4b   : > { %530 = vmatpush.msra.mxu0 %v507_v4  ;;  %v505_v9 = vld [vmem:[#allocation7] sm:$0xff]  ;;  %v504_v10 = vadd.f32 %v503_v7, %v502_v6  ;;  %588 = vmatpush.msra.mxu2 %v568_v17  ;;  %v566_v19 = vld [vmem:[#allocation10 + $0x8] sm:$0xff]  ;;  %s1098_s24 = sshll.u32 %s1507_s16, 3  ;;  %s1854_s17 = sld [smem:[#allocation30_spill]] }
  0x4c   : > { %559 = vmatpush.msra.mxu1 %v538_v3  ;;  %v1217_v11 = vld [vmem:[%s1822_s5] ss:$0 sm:$0xff]  ;;  %s914_s13 = scalar_lea.hbm %s1827_s10, %s1098_s24  ;;  %s501_s19 = scalar_lea.vmem [#allocation13], %s1705_s2 }
  0x4d   : > { %531 = vmatpush.msra.mxu0 %v506_v5  ;;  %v1218_v12 = vld [vmem:[%s1820_s3] ss:$0 sm:$0xff]  ;;  %589 = vmatpush.msra.mxu2 %v567_v18  ;;  %s916_s23 = sshll.u32 %s501_s19, 4  ;;  %s918_s20 = sshll.u32 %s914_s13, 4  ;;  %s917_s23 = int_to_ptr.vmem [resolvable:$true] %s916_s23  ;;  %s919_s20 = int_to_ptr.hbm [resolvable:$true] %s918_s20 }
  0x4e   : > { %560 = vmatpush.msra.mxu1 %v537_v8  ;;  %v565_v20 = vld [vmem:[#allocation10] sm:$0xff]  ;;  %s903_s26 = scalar_lea.sflag [#allocation4], %s1702_s8  ;;  %s1431_s16 = sshra.s32 %s919_s20, 4  ;;  %s1432_s16 = int_to_ptr.hbm [resolvable:$true] %s1431_s16 }
  0x4f   : > { %532 = vmatpush.msra.mxu0 %v505_v9  ;;  %1082 = vmatmul.msk.f32.vlgmr.msra.gmra.mxu1 %vm513_vm0, %v504_v10  ;;  %v1219_v29 = vld [vmem:[%s1824_s7] ss:$0 sm:$0xff]  ;;  %s1437_s2 = scalar_lea.hbm %s1827_s10, 16  ;;  %p1438_p10 = scmp.lt.s32.totalorder %s1432_s16, %s1827_s10 }
  0x50   : > { %1081 = vmatmul.msk.f32.vlgmr.msra.gmra.mxu0 %vm513_vm0, %v504_v10  ;;  %590 = vmatpush.msra.mxu2 %v566_v19  ;;  %v873_v10 = vld [vmem:[#allocation11 + $0x18] sm:$0xff] }
  0x52   : > { %591 = vmatpush.msra.mxu2 %v565_v20 }
  0x53   : > { %1083 = vmatmul.msk.f32.vlgmr.msra.gmra.mxu2 %vm513_vm0, %v502_v6 }
  0xcc   : > { %v562_v13 = vpop.f32.mrf.mxu1 }
  0xcd   : > { %v534_v14 = vpop.f32.mrf.mxu0  ;;  %v563_v15 = vadd.f32 %v1217_v11, %v562_v13  ;;  %v872_v11 = vld [vmem:[#allocation11 + $0x10] sm:$0xff]  ;;  %v870_v13 = vld [vmem:[#allocation11] sm:$0xff] }
  0xce   : > { %v535_v16 = vadd.f32 %v1218_v12, %v534_v14  ;;  %v871_v12 = vld [vmem:[#allocation11 + $0x8] sm:$0xff] }
  0xcf   : > { %790 = vrot.lane.b32.xlu2 %v563_v15, %s1523_s11  ;;  %659 = vrot.lane.b32.xlu1 %v563_v15, %s1524_s27 }
  0xd0   : > { %725 = vrot.lane.b32.xlu0 %v563_v15, %s1525_s28  ;;  %1084 = vmatpush.xpose.msk.msra.mxu3 %vm596_vm1, %v563_v15 }
  0xd3   : > { %1085 = vmatmul.msk.f32.vlgmr.msra.gmra.mxu3 %vm596_vm1, %v535_v16 }
  0xd6   : > { %v593_v30 = vpop.f32.mrf.mxu2 }
  0xd7   : > { %788 = vrot.lane.b32.xlu2 %v535_v16, %s1523_s11  ;;  %657 = vrot.lane.b32.xlu1 %v535_v16, %s1524_s27  ;;  %v594_v31 = vadd.f32 %v1219_v29, %v593_v30 }
  0xd8   : > { %723 = vrot.lane.b32.xlu0 %v535_v16, %s1525_s28 }
  0xd9   : > { %650 = vmatpush.msrb.mxu3 %v594_v31 }
 0x129   : > { %v791_v22 = vpop.permute.xlu2 %790 }
 0x131   : > { %v789_v26 = vpop.permute.xlu2 %788 }
 0x141   : > { %v660_v21 = vpop.permute.xlu1 %659 }
 0x142   : > { %v726_v23 = vpop.permute.xlu0 %725  ;;  %1087 = vmatpush.xpose.msk.msrb.mxu0 %vm596_vm1, %v660_v21 }
 0x143   : > { %1090 = vmatpush.xpose.msk.msrb.mxu2 %vm596_vm1, %v726_v23  ;;  %v1220_v23 = vld [vmem:[%s1854_s17] ss:$0 sm:$0xff] }
 0x146   : > { %1093 = vmatpush.xpose.msk.msra.mxu0 %vm596_vm1, %v791_v22 }
 0x147   : > { %893 = vmatpush.msra.mxu2 %v873_v10 }
 0x149   : > { %v658_v24 = vpop.permute.xlu1 %657  ;;  %894 = vmatpush.msra.mxu2 %v872_v11 }
 0x14a   : > { %v724_v25 = vpop.permute.xlu0 %723  ;;  %1088 = vmatmul.msk.f32.vlgmr.msrb.gmra.mxu0 %vm596_vm1, %v658_v24 }
 0x14b   : > { %1091 = vmatmul.msk.f32.vlgmr.msrb.gmra.mxu2 %vm596_vm1, %v724_v25 }
 0x14c   : > { %895 = vmatpush.msra.mxu2 %v871_v12 }
 0x14e   : > { %896 = vmatpush.msra.mxu2 %v870_v13 }
 0x152   : > { %1094 = vmatmul.msk.f32.vlgmr.msra.gmra.mxu0 %vm596_vm1, %v789_v26 }
 0x156   : > { %v620_v27 = vpop.f32.mrf.mxu3 }
 0x157   : > { %v623_v28 = vsel %vm596_vm1, %v620_v27, -inf }
 0x158   : > { %624 = vmax.xlane.f32.xlu0 %v623_v28 }
 0x16c   : > { %695 = vrot.lane.b32.xlu0 %v594_v31, %s1524_s27 }
 0x1c7   : > { %v682_v32 = vpop.f32.mrf.mxu0 }
 0x1c8   : > { %v685_v33 = vsel %vm596_vm1, %v682_v32, -inf }
 0x1c9   : > { %686 = vmax.xlane.f32.xlu1 %v685_v33 }
 0x1cb   : > { %v625_v34 = vpop.xlane.xlu0 %624 }
 0x1cc   : > { %v626_v35 = vsub.f32 %v620_v27, %v625_v34 }
 0x1ce   : > { %v627_v36 = vmul.f32 1.442695, %v626_v35  ;;  %v748_v37 = vpop.f32.mrf.mxu2 }
 0x1cf   : > { %v751_v38 = vsel %vm596_vm1, %v748_v37, -inf  ;;  %v813_v39 = vpop.f32.mrf.mxu0 }
 0x1d0   : > { %1221 = vpow2.f32 %v627_v36  ;;  %752 = vmax.xlane.f32.xlu2 %v751_v38  ;;  %v816_v41 = vsel %vm596_vm1, %v813_v39, -inf }
 0x1d6   : > { %v1222_v40 = vpop.eup %1221 }
 0x1d7   : > { %1086 = vmatmul.msk.f32.vlgmr.msrb.gmra.mxu3 %vm596_vm1, %v1222_v40  ;;  %v629_v56 = vsel %vm596_vm1, %v1222_v40, 0.0 }
 0x1d8   : > { %817 = vmax.xlane.f32.xlu2 %v816_v41 }
 0x1de   : > { %v696_v42 = vpop.permute.xlu0 %695 }
 0x1df   : > { %716 = vmatpush.msrb.mxu1 %v696_v42 }
 0x1e2   : > { %760 = vrot.lane.b32.xlu1 %v594_v31, %s1525_s28 }
 0x1f0   : > { %825 = vrot.lane.b32.xlu2 %v594_v31, %s1523_s11  ;;  %s1433_s11 = scalar_lea.hbm %s1432_s16, 8 }
 0x1f1   : > { %p1434_p1 = scmp.ne.s32.totalorder %s1432_s16, %s1433_s11  ;;  %p1439_p11 = scmp.lt.s32.totalorder %s1437_s2, %s1433_s11 }
 0x1f3   : > { %p1435_p3 = pnand %p1434_p1, %p1676_p2  ;;  %p1440_p12 = por %p1439_p11, %p1438_p10 }
 0x1f5   : > { %p1436_p9 = pneg %p1435_p3 }
 0x1f7   : > { %p1441_p13 = pnand %p1440_p12, %p1436_p9 }
 0x23c   : > { %v687_v43 = vpop.xlane.xlu1 %686 }
 0x23d   : > { %v688_v44 = vsub.f32 %v682_v32, %v687_v43 }
 0x23f   : > { %v689_v45 = vmul.f32 1.442695, %v688_v44 }
 0x241   : > { %1223 = vpow2.f32 %v689_v45 }
 0x243   : > { %v753_v46 = vpop.xlane.xlu2 %752 }
 0x244   : > { %v754_v47 = vsub.f32 %v748_v37, %v753_v46 }
 0x246   : > { %v755_v48 = vmul.f32 1.442695, %v754_v47 }
 0x247   : > { %v1224_v49 = vpop.eup %1223 }
 0x248   : > { %1225 = vpow2.f32 %v755_v48  ;;  %1089 = vmatmul.msk.f32.vlgmr.msrb.gmra.mxu1 %vm596_vm1, %v1224_v49  ;;  %v691_v50 = vsel %vm596_vm1, %v1224_v49, 0.0 }
 0x249   : > { %692 = vadd.xlane.f32.xlu0 %v691_v50 }
 0x24b   : > { %v818_v51 = vpop.xlane.xlu2 %817 }
 0x24c   : > { %v819_v52 = vsub.f32 %v813_v39, %v818_v51 }
 0x24e   : > { %v1226_v53 = vpop.eup %1225  ;;  %v820_v54 = vmul.f32 1.442695, %v819_v52 }
 0x24f   : > { %v757_v55 = vsel %vm596_vm1, %v1226_v53, 0.0 }
 0x250   : > { %1227 = vpow2.f32 %v820_v54  ;;  %758 = vadd.xlane.f32.xlu1 %v757_v55 }
 0x251   : > { %630 = vadd.xlane.f32.xlu0 %v629_v56 }
 0x253   : > { %v826_v57 = vpop.permute.xlu2 %825 }
 0x254   : > { %846 = vmatpush.msra.mxu1 %v826_v57  ;;  %v761_v58 = vpop.permute.xlu1 %760 }
 0x255   : > { %781 = vmatpush.msra.mxu3 %v761_v58 }
 0x256   : > { %v1228_v59 = vpop.eup %1227  ;;  %1092 = vmatmul.msk.f32.vlgmr.msra.gmra.mxu3 %vm596_vm1, %v1226_v53 }
 0x257   : > { %1095 = vmatmul.msk.f32.vlgmr.msra.gmra.mxu1 %vm596_vm1, %v1228_v59  ;;  %v822_v60 = vsel %vm596_vm1, %v1228_v59, 0.0 }
 0x258   : > { %823 = vadd.xlane.f32.xlu2 %v822_v60 }
 0x25a   : > { %v652_v3 = vpop.f32.mrf.mxu3 }
 0x2bc   : > { %v693_v61 = vpop.xlane.xlu0 %692 }
 0x2bd   : > { %1229 = vrcp.f32 %v693_v61 }
 0x2c3   : > { %v1230_v62 = vpop.eup %1229  ;;  %v759_v2 = vpop.xlane.xlu1 %758 }
 0x2c4   : > { %v631_v14 = vpop.xlane.xlu0 %630 }
 0x2c5   : > { %v718_v63 = vpop.f32.mrf.mxu1 }
 0x2c6   : > { %v722_v0 = vmul.f32 %v1230_v62, %v718_v63 }
 0x2c8   : > { %854 = vrot.lane.b32.xlu1 %v722_v0, %s1526_s21 }
 0x2cb   : > { %v824_v1 = vpop.xlane.xlu2 %823 }
 0x2cc   : > { %1231 = vrcp.f32 %v824_v1 }
 0x2cd   : > { %1233 = vrcp.f32 %v759_v2 }
 0x2ce   : > { %1235 = vrcp.f32 %v631_v14 }
 0x2d2   : > { %v1232_v4 = vpop.eup %1231 }
 0x2d3   : > { %v1234_v7 = vpop.eup %1233 }
 0x2d4   : > { %v848_v5 = vpop.f32.mrf.mxu1  ;;  %v1236_v15 = vpop.eup %1235 }
 0x2d5   : > { %v852_v6 = vmul.f32 %v1232_v4, %v848_v5  ;;  %v656_v17 = vmul.f32 %v1236_v15, %v652_v3 }
 0x2d7   : > { %862 = vrot.lane.b32.xlu2 %v852_v6, %s1527_s4 }
 0x2d9   : > { %v783_v8 = vpop.f32.mrf.mxu3 }
 0x2da   : > { %v787_v9 = vmul.f32 %v1234_v7, %v783_v8 }
 0x2dc   : > { %858 = vrot.lane.b32.xlu0 %v787_v9, %s1528_s29 }
 0x331   : > { %v863_v20 = vpop.permute.xlu2 %862 }
 0x33a   : > { %v855_v16 = vpop.permute.xlu1 %854 }
 0x33b   : > { %v865_v18 = vsel %vm596_vm1, %v656_v17, %v855_v16 }
 0x34e   : > { %v859_v19 = vpop.permute.xlu0 %858 }
 0x34f   : > { %v867_v21 = vsel %vm866_vm2, %v865_v18, %v859_v19 }
 0x350   : > { %v869_v22 = vsel %vm868_vm3, %v867_v21, %v863_v20 }
 0x351   : > { %1096 = vmatmul.msk.f32.vlgmr.msra.gmra.mxu2 %vm513_vm0, %v869_v22 }
 0x3d4   : > { %v898_v24 = vpop.f32.mrf.mxu2 }
 0x3d5   : > { %v899_v25 = vadd.f32 %v1220_v23, %v898_v24 }
 0x3d7   : > { %901 = vst.msk [vmem:[%s501_s19] sm:$0xff] %vm513_vm0, %v899_v25 }
 0x3d8   : > { %1444 = shalt.err (!%p1441_p13)
}
 0x3d9   : > { %1121 = dma.vmem_to_hbm [thread:$0]  (%p1676_p2), %s917_s23, 128, %s919_s20, %s903_s26  }
 0x3da PF: > { %s1855_s8 = sld [smem:[#allocation20_spill]]  ;;  %p1144_p0 = pnand %p1068_p6, %p1683_p5 }
 0x3dc   : > { %p1145_p4 = pneg %p1144_p0 }
 0x3e0   : > { %s930_s4 = sand.u32 1, %s1855_s8  }
 0x3e1   : > { %s931_s29 = scalar_lea.sflag [#allocation4], %s930_s4 }
 0x3e2   : > { %1490 = dma.done.wait (%p1145_p4), %s931_s29, 128  }
 0x3e3   : > { %1492 = vsyncadd (%p1145_p4), %s931_s29, 4294967168  ;;  %s31_s18 = sadd.s32 1, %s1515_s18   ;;  %s1857_s24 = sld [smem:[#allocation21_spill]] }
 0x3e4   : > { %p28_p7 = scmp.ge.s32.totalorder %s31_s18, 4   ;;  %s1858_s15 = sld [smem:[#allocation24_spill]] }
 0x3e5   : > { %s1859_s16 = sld [smem:[#allocation22_spill]]  ;;  %s1861_s13 = smov %s1499_s14 }
 0x3e6   : > { %s1860_s17 = sld [smem:[#allocation23_spill]]  ;;  %30 = sbr.rel (!%p28_p7) target bundleno = 16 (0x10), region = 134 }
 0x3e9   : > { %s1862_s14 = smov %s1857_s24 }
 0x3eb   :  { %937 = vsyncpa [#allocation3], 1 }
 0x3ec   :  { %939 = vsyncpa [#allocation3 + $0x1], 1 }
 0x3ed   :  { %940 = vsyncpa [#allocation6], 1 }
 0x3ee   :  { %942 = vsyncpa [#allocation6 + $0x1], 1 }
 0x3ef   :  { %943 = vsyncpa [#allocation9], 1 }
 0x3f0   :  { %944 = vsyncpa [#allocation12], 1 }
 0x3f1   :  { %945 = vsyncpa [#allocation4], 1 }
 0x3f2   :  { %947 = vsyncpa [#allocation4 + $0x1], 1 }

</bundles_post_ra>
